<compile_context>
chip_gen: v7x
topology: tpu7x:2x2x1
jax: 0.10.0
libtpu: 0.0.40
codegen_flags: <defaults>
</compile_context>

<pallas_src>
import jax
import jax.numpy as jnp
from jax.experimental import pallas as pl
from jax.experimental.pallas import tpu as pltpu

IN_F, HID_F, OUT_F = 56, 32, 16


def _round_up(n, m):
    return ((n + m - 1) // m) * m


def mlp_kernel(x_ref, w1_ref, b1_ref, w2_ref, b2_ref, o_ref):
    # x_ref: (TB, 56) bf16, w1_ref: (56, 32) bf16, b1_ref: (1, 32) f32,
    # w2_ref: (32, 16) bf16, b2_ref: (1, 16) f32, o_ref: (TB, 16) f32
    x = x_ref[...]
    h = jnp.dot(x, w1_ref[...], preferred_element_type=jnp.float32) + b1_ref[...]
    h = jnp.maximum(h, 0.0)  # ReLU
    y = jnp.dot(h.astype(w2_ref.dtype), w2_ref[...],
                preferred_element_type=jnp.float32) + b2_ref[...]
    o_ref[...] = y.astype(o_ref.dtype)


def mlp_forward(x, w1, b1, w2, b2, tb=512):
    """x: (B, 56) f32.  Returns squeeze(relu(x@W1+b1)@W2+b2) as f32."""
    B = x.shape[0]

    # bf16 for the HBM-resident matmul operands (bandwidth-bound kernel);
    # biases and output stay f32, accumulation is f32 on the MXU.
    x_bf = x.astype(jnp.bfloat16)
    w1_bf = w1.astype(jnp.bfloat16)
    w2_bf = w2.astype(jnp.bfloat16)

    # Batch tile: multiple of 8 (sublane), clamped so tiny batches still work.
    TB = min(tb, _round_up(B, 8))
    TB = _round_up(TB, 8)
    Bp = _round_up(B, TB)
    if Bp != B:
        x_bf = jnp.pad(x_bf, ((0, Bp - B), (0, 0)))

    out = pl.pallas_call(
        mlp_kernel,
        out_shape=jax.ShapeDtypeStruct((Bp, OUT_F), jnp.float32),
        grid_spec=pl.GridSpec(
            grid=(Bp // TB,),
            in_specs=[
                pl.BlockSpec((TB, IN_F), lambda i: (i, 0)),     # x: tiled over batch
                pl.BlockSpec((IN_F, HID_F), lambda i: (0, 0)),  # W1: resident
                pl.BlockSpec((1, HID_F), lambda i: (0, 0)),     # b1: resident
                pl.BlockSpec((HID_F, OUT_F), lambda i: (0, 0)),  # W2: resident
                pl.BlockSpec((1, OUT_F), lambda i: (0, 0)),     # b2: resident
            ],
            out_specs=pl.BlockSpec((TB, OUT_F), lambda i: (i, 0)),
        ),
        compiler_params=pltpu.CompilerParams(
            dimension_semantics=("parallel",),  # independent batch tiles -> megacore OK
        ),
    )(x_bf, w1_bf, b1, w2_bf, b2)

    out = out[:B]
    # PyTorch .squeeze(): drop all size-1 dims (also drops batch dim when B == 1).
    return jnp.squeeze(out)


def ref_forward(x, w1, b1, w2, b2):
    # Pure-JAX reference using the same bf16 operand quantization as the kernel.
    xb = x.astype(jnp.bfloat16).astype(jnp.float32)
    w1b = w1.astype(jnp.bfloat16).astype(jnp.float32)
    w2b = w2.astype(jnp.bfloat16).astype(jnp.float32)
    h = jnp.maximum(xb @ w1b + b1, 0.0)
    h = h.astype(jnp.bfloat16).astype(jnp.float32)
    return jnp.squeeze(h @ w2b + b2)


def init_params(key):
    k1, k2, k3, k4 = jax.random.split(key, 4)
    # Mimics nn.Linear's uniform(-1/sqrt(fan_in), 1/sqrt(fan_in)) init.
    lim1 = 1.0 / jnp.sqrt(IN_F)
    lim2 = 1.0 / jnp.sqrt(HID_F)
    w1 = jax.random.uniform(k1, (IN_F, HID_F), jnp.float32, -lim1, lim1)
    b1 = jax.random.uniform(k2, (1, HID_F), jnp.float32, -lim1, lim1)
    w2 = jax.random.uniform(k3, (HID_F, OUT_F), jnp.float32, -lim2, lim2)
    b2 = jax.random.uniform(k4, (1, OUT_F), jnp.float32, -lim2, lim2)
    return w1, b1, w2, b2


if __name__ == "__main__":
    key = jax.random.PRNGKey(0)
    kx, kp = jax.random.split(key)
    w1, b1, w2, b2 = init_params(kp)

    # Small-batch check (single tile).
    B = 8
    x = jax.random.normal(kx, (B, IN_F), jnp.float32)
    out = jax.block_until_ready(mlp_forward(x, w1, b1, w2, b2))
    ref = ref_forward(x, w1, b1, w2, b2)
    assert out.shape == (B, OUT_F), out.shape
    assert jnp.allclose(out, ref, atol=1e-3, rtol=1e-2), float(jnp.max(jnp.abs(out - ref)))

    # Multi-tile + ragged-batch check: B=200 with a 64-row tile -> grid=(4,), padded to 256.
    B2 = 200
    x2 = jax.random.normal(jax.random.PRNGKey(1), (B2, IN_F), jnp.float32)
    out2 = jax.block_until_ready(mlp_forward(x2, w1, b1, w2, b2, tb=64))
    ref2 = ref_forward(x2, w1, b1, w2, b2)
    assert out2.shape == (B2, OUT_F), out2.shape
    assert jnp.allclose(out2, ref2, atol=1e-3, rtol=1e-2), float(jnp.max(jnp.abs(out2 - ref2)))

    print("KERNEL_OK")
</pallas_src>

<mosaic_0001>
module attributes {stable_mosaic.version = 11 : i64} {
  func.func @mlp_kernel(%arg0: i32, %arg1: memref<8x56xbf16, #tpu.memory_space<vmem>>, %arg2: memref<56x32xbf16, #tpu.memory_space<vmem>>, %arg3: memref<1x32xf32, #tpu.memory_space<vmem>>, %arg4: memref<32x16xbf16, #tpu.memory_space<vmem>>, %arg5: memref<1x16xf32, #tpu.memory_space<vmem>>, %arg6: memref<8x16xf32, #tpu.memory_space<vmem>>) attributes {dimension_semantics = [#tpu.dimension_semantics<parallel>], iteration_bounds = array<i64: 1>, scalar_prefetch = 0 : i64, scratch_operands = 0 : i64, tpu.core_type = #tpu.core_type<tc>, window_params = [{transform_indices = @transform_0, window_bounds = array<i64: 8, 56>}, {pipeline_mode = #tpu.pipeline_mode<synchronous>, transform_indices = @transform_1, window_bounds = array<i64: 56, 32>}, {pipeline_mode = #tpu.pipeline_mode<synchronous>, transform_indices = @transform_2, window_bounds = array<i64: 1, 32>}, {pipeline_mode = #tpu.pipeline_mode<synchronous>, transform_indices = @transform_3, window_bounds = array<i64: 32, 16>}, {pipeline_mode = #tpu.pipeline_mode<synchronous>, transform_indices = @transform_4, window_bounds = array<i64: 1, 16>}, {transform_indices = @transform_5, window_bounds = array<i64: 8, 16>}]} {
    %c0 = arith.constant 0 : index
    %c0_0 = arith.constant 0 : index
    %0 = vector.load %arg1[%c0, %c0_0] : memref<8x56xbf16, #tpu.memory_space<vmem>>, vector<8x56xbf16>
    %c0_1 = arith.constant 0 : index
    %c0_2 = arith.constant 0 : index
    %1 = vector.load %arg2[%c0_1, %c0_2] : memref<56x32xbf16, #tpu.memory_space<vmem>>, vector<56x32xbf16>
    %cst = arith.constant dense<0.000000e+00> : vector<8x32xf32>
    %2 = tpu.matmul %0, %1, %cst {dimension_numbers = #tpu.dot_dimension_numbers<[1], [0], [0], [1], [0, 0, 1, 1], [], []>} : vector<8x56xbf16>, vector<56x32xbf16>, vector<8x32xf32> -> vector<8x32xf32>
    %c0_3 = arith.constant 0 : index
    %c0_4 = arith.constant 0 : index
    %3 = vector.load %arg3[%c0_3, %c0_4] : memref<1x32xf32, #tpu.memory_space<vmem>>, vector<1x32xf32>
    %4 = vector.broadcast %3 : vector<1x32xf32> to vector<8x32xf32>
    %5 = arith.addf %2, %4 : vector<8x32xf32>
    %cst_5 = arith.constant 0.000000e+00 : f32
    %6 = vector.broadcast %cst_5 : f32 to vector<8x32xf32>
    %7 = arith.maximumf %5, %6 : vector<8x32xf32>
    %8 = arith.truncf %7 : vector<8x32xf32> to vector<8x32xbf16>
    %c0_6 = arith.constant 0 : index
    %c0_7 = arith.constant 0 : index
    %9 = vector.load %arg4[%c0_6, %c0_7] : memref<32x16xbf16, #tpu.memory_space<vmem>>, vector<32x16xbf16>
    %cst_8 = arith.constant dense<0.000000e+00> : vector<8x16xf32>
    %10 = tpu.matmul %8, %9, %cst_8 {dimension_numbers = #tpu.dot_dimension_numbers<[1], [0], [0], [1], [0, 0, 1, 1], [], []>} : vector<8x32xbf16>, vector<32x16xbf16>, vector<8x16xf32> -> vector<8x16xf32>
    %c0_9 = arith.constant 0 : index
    %c0_10 = arith.constant 0 : index
    %11 = vector.load %arg5[%c0_9, %c0_10] : memref<1x16xf32, #tpu.memory_space<vmem>>, vector<1x16xf32>
    %12 = vector.broadcast %11 : vector<1x16xf32> to vector<8x16xf32>
    %13 = arith.addf %10, %12 : vector<8x16xf32>
    %c0_11 = arith.constant 0 : index
    %c0_12 = arith.constant 0 : index
    %14 = vector.load %arg6[%c0_11, %c0_12] : memref<8x16xf32, #tpu.memory_space<vmem>>, vector<8x16xf32>
    tpu.vector_store %arg6[%c0_11, %c0_12], %13 {strides = array<i32>} : memref<8x16xf32, #tpu.memory_space<vmem>>, vector<8x16xf32>,
    return
  }
  func.func @transform_0(%arg0: i32) -> (i32, i32) {
    %c0_i32 = arith.constant 0 : i32
    %c0_i32_0 = arith.constant 0 : i32
    return %arg0, %c0_i32 : i32, i32
  }
  func.func @transform_1(%arg0: i32) -> (i32, i32) {
    %c0_i32 = arith.constant 0 : i32
    %c0_i32_0 = arith.constant 0 : i32
    %c0_i32_1 = arith.constant 0 : i32
    return %c0_i32, %c0_i32_0 : i32, i32
  }
  func.func @transform_2(%arg0: i32) -> (i32, i32) {
    %c0_i32 = arith.constant 0 : i32
    %c0_i32_0 = arith.constant 0 : i32
    %c0_i32_1 = arith.constant 0 : i32
    return %c0_i32, %c0_i32_0 : i32, i32
  }
  func.func @transform_3(%arg0: i32) -> (i32, i32) {
    %c0_i32 = arith.constant 0 : i32
    %c0_i32_0 = arith.constant 0 : i32
    %c0_i32_1 = arith.constant 0 : i32
    return %c0_i32, %c0_i32_0 : i32, i32
  }
  func.func @transform_4(%arg0: i32) -> (i32, i32) {
    %c0_i32 = arith.constant 0 : i32
    %c0_i32_0 = arith.constant 0 : i32
    %c0_i32_1 = arith.constant 0 : i32
    return %c0_i32, %c0_i32_0 : i32, i32
  }
  func.func @transform_5(%arg0: i32) -> (i32, i32) {
    %c0_i32 = arith.constant 0 : i32
    %c0_i32_0 = arith.constant 0 : i32
    return %arg0, %c0_i32 : i32, i32
  }
}

</mosaic_0001>

<bundles_post_ra>
// kernel: tpu_custom_call.1
= control target key start
LH: loop header
LB: loop body
LE: loop exit
PB: predicated region body
PF: predicated region fallthrough
CT: control target
= control target key end

     0   :  { %v262_v1 = vmov 0.0   ;;  %vm263_vm0 = vmmov 0   ;;  %s334_s0 = inlined_call_operand.vmem [shape: bf16[8,56], index: 0, kind: input, shape index: {}]   ;;  %s335_s1 = inlined_call_operand.vmem [shape: bf16[56,32], index: 1, kind: input, shape index: {}]   ;;  %s336_s2 = inlined_call_operand.vmem [shape: f32[1,32], index: 2, kind: input, shape index: {}]   ;;  %s337_s3 = inlined_call_operand.vmem [shape: bf16[32,16], index: 3, kind: input, shape index: {}]   ;;  %s338_s4 = inlined_call_operand.vmem [shape: f32[1,16], index: 4, kind: input, shape index: {}]   ;;  %s339_s5 = inlined_call_operand.hbm [shape: f32[8,16], index: 5, kind: output, shape index: {}]  }
   0x1   :  { %v232_v0 = vld [vmem:[%s335_s1] sm:$0xff]   ;;  %209 = vmatprep.subr.bf16.mxu0 %v262_v1  ;;  %221 = vmatprep.subr.bf16.mxu1 %v262_v1  ;;  %v233_v2 = vld [vmem:[%s335_s1 + $0x8] sm:$0xff]   ;;  %v234_v3 = vld [vmem:[%s335_s1 + $0x10] sm:$0xff]  }
   0x2   :  { %210 = vmatpush3.bf16.msra.mxu0 %v232_v0  ;;  %217 = vmatprep.mubr.msk.bf16.mxu0 %vm263_vm0, %v262_v1 }
   0x3   :  { %211 = vmatprep.subr.bf16.mxu0 %v262_v1  ;;  %225 = vmatprep.mubr.msk.bf16.mxu1 %vm263_vm0, %v262_v1 }
   0x6   :  { %212 = vmatpush3.bf16.msra.mxu0 %v233_v2 }
   0x7   :  { %10 = vsyncpa [#allocation3], 0  ;;  %213 = vmatprep.subr.bf16.mxu0 %v262_v1  ;;  %v235_v4 = vld [vmem:[%s335_s1 + $0x18] ss:$0 sps:$4 sm:$0xff]   ;;  %vm62_vm1 = vcmask 1043456   ;;  %vm58_vm2 = vcmask 457728  }
   0x8   :  { %v64_v5 = vsel %vm62_vm1, %v235_v4, 0  ;;  %v22_v6 = vld [vmem:[%s334_s0] sm:$0xf]  ;;  %v237_v8 = vld [vmem:[%s337_s3 + $0x8] sm:$0xff]   ;;  %vm131_vm3 = vcmask 261120   ;;  %s264_s9 = smov [#allocation2]  }
   0x9   :  { %v236_v7 = vld [vmem:[%s337_s3] sm:$0xff]   ;;  %s183_s3 = sshll.u32 %s264_s9, 4  ;;  %vm175_vm4 = vcmask 130048   ;;  %s184_s3 = int_to_ptr.vmem [resolvable:$true] %s183_s3 }
   0xa   :  { %214 = vmatpush3.bf16.msra.mxu0 %v234_v3  ;;  %222 = vmatpush3.bf16.msra.mxu1 %v236_v7  ;;  %v191_v9 = vld [vmem:[%s336_s2] ss:$0 sm:$0xff]  ;;  %s238_s2 = scalar_lea.vmem %s184_s3, 128  ;;  %p243_p1 = scmp.lt.s32.totalorder %s184_s3, %s184_s3 }
   0xb   :  { %215 = vmatprep.subr.bf16.mxu0 %v262_v1  ;;  %223 = vmatprep.subr.bf16.mxu1 %v262_v1  ;;  %v197_v17 = vld [vmem:[%s338_s4] ss:$0 sm:$0xff]  ;;  %p239_p0 = scmp.ne.s32.totalorder %s184_s3, %s238_s2  ;;  %p244_p2 = scmp.lt.s32.totalorder %s238_s2, %s238_s2 }
   0xd   :  { %p245_p3 = por %p244_p2, %p243_p1 }
   0xe   :  { %216 = vmatpush3.bf16.msra.mxu0 %v64_v5  ;;  %224 = vmatpush3.bf16.msra.mxu1 %v237_v8 }
   0xf   :  { %p246_p4 = pnand %p245_p3, %p239_p0 }
  0x11   :  { %218 = vmatmul.mubr.msk.bf16.vlgmr.msra.gmra.mrb[0].mxu0 %vm58_vm2, %v22_v6 }
  0xe4   :  { %v100_v10 = vpop.f32.mrb[0].mxu0 }
  0xe5   :  { %v101_v11 = vadd.f32 %v191_v9, %v100_v10  ;;  %v219_v12 = vpop.f32.mrb[1].mxu0 }
  0xe6   :  { %v103_v13 = vpop.f32.mrb[2].mxu0 }
  0xe7   :  { %v106_v14 = vmax.f32 %v101_v11, 0.0  ;;  %v220_v15 = vpop.f32.mrb[3].mxu0 }
  0xe9   :  { %v107_v16 = vpack.c.bf16 %v106_v14, %v106_v14 }
  0xeb   :  { %226 = vmatmul.mubr.msk.bf16.vlgmr.msra.gmra.mrb[0].mxu1 %vm131_vm3, %v107_v16 }
 0x1be   :  { %v169_v18 = vpop.f32.mrb[0].mxu1 }
 0x1bf   :  { %v170_v19 = vadd.f32 %v197_v17, %v169_v18  ;;  %v227_v20 = vpop.f32.mrb[1].mxu1 }
 0x1c0   :  { %v172_v21 = vpop.f32.mrb[2].mxu1 }
 0x1c1   :  { %v228_v22 = vpop.f32.mrb[3].mxu1  ;;  %176 = vst.msk [vmem:[#allocation2] sm:$0xff] %vm175_vm4, %v170_v19 }
 0x1c2   :  { %249 = shalt.err (!%p246_p4)
}
 0x1c3   :  { %s250_s4 = scalar_lea.hbm %s339_s5, 128 }
 0x1c4   :  { %p251_p5 = scmp.ne.s32.totalorder %s339_s5, %s250_s4  ;;  %p254_p6 = scmp.lt.u32.totalorder %s250_s4, %s339_s5 }
 0x1c6   :  { %p256_p7 = pnand %p254_p6, %p251_p5 }
 0x1c8   :  { %259 = shalt.err (!%p256_p7)
}
 0x1c9   :  { %186 = dma.vmem_to_hbm [thread:$0]  %s184_s3, 128, %s339_s5, [#allocation3]  }
 0x1ca   :  { %260 = dma.done.wait [#allocation3], 128  }
 0x1cb   :  { %261 = vsyncadd [#allocation3], 4294967168 }
 0x1cc   :  { %190 = vsyncpa [#allocation3], 1 }

</bundles_post_ra>
